<compile_context>
chip_gen: v7x
topology: tpu7x:2x2x1
jax: 0.10.0
libtpu: 0.0.40
codegen_flags: <defaults>
</compile_context>

<pallas_src>
import math

import jax
import jax.numpy as jnp
from jax.experimental import pallas as pl
from jax.experimental.pallas import tpu as pltpu


def _round_up(n, m):
    return ((n + m - 1) // m) * m


# ----------------------------------------------------------------------------
# Kernel
# ----------------------------------------------------------------------------
def _make_kernel(L, Lp):
    def data_embedding_kernel(x_ref, w_ref, o_ref):
        """x_ref: (bb, Lp, C) bf16; w_ref: (3C, H) bf16; o_ref: (bb, L, H)."""
        bb, _, C = x_ref.shape
        H = o_ref.shape[-1]

        x = x_ref[...]  # compute dtype (bf16); no f32 round trip

        # Circular halo, entirely in the compute dtype, no (L+2) buffer:
        #   x_prev[:, t] = x[:, (t - 1) % Lp],   x_next[:, t] = x[:, (t + 1) % Lp]
        # (static slice + concat == jnp.roll; pltpu.roll(+/-1, axis=1) is the
        #  XLU-slot alternative for this C-narrow, off-critical-path block)
        x_prev = jnp.concatenate([x[:, Lp - 1:, :], x[:, :Lp - 1, :]], axis=1)
        x_next = jnp.concatenate([x[:, 1:, :], x[:, :1, :]], axis=1)

        # im2col along lanes; column block k pairs with conv tap k = 0, 1, 2.
        x_cat = jnp.concatenate([x_prev, x, x_next], axis=-1)        # (bb, Lp, 3C)

        # One fused MXU GEMM.  Lp % 8 == 0, so both reshapes are
        # layout-preserving dim merges (no VMEM relayout copy).
        acc = jnp.dot(x_cat.reshape(bb * Lp, 3 * C), w_ref[...],
                      preferred_element_type=jnp.float32)            # (bb*Lp, H)
        acc = acc.reshape(bb, Lp, H)
        if Lp != L:
            acc = acc[:, :L, :]                                      # drop pad rows
        o_ref[...] = acc.astype(o_ref.dtype)

    return data_embedding_kernel


# ----------------------------------------------------------------------------
# Generation-aware sizing helpers
# ----------------------------------------------------------------------------
def _tpu_vmem_capacity_bytes():
    try:
        cap = int(pltpu.get_tpu_info().vmem_capacity_bytes)
        if cap > 0:
            return cap
    except Exception:
        pass
    return 128 * 1024 * 1024  # v5e/v6e default


def _has_multiple_tensorcores():
    try:
        kind = (getattr(jax.local_devices()[0], "device_kind", "") or "").lower()
    except Exception:
        return False
    return any(tag in kind for tag in ("v7", "v5p", "v4"))


def _vmem_estimate(bb, Lp, C, H, out_itemsize, *, weight_buffers=2, in_itemsize=2):
    """Per-grid-step VMEM bytes, counting (8,128) sublane/lane tile padding."""
    Cp = _round_up(C, 128)
    C3p = _round_up(3 * C, 128)
    Hp = _round_up(H, 128)
    w_bytes = weight_buffers * _round_up(3 * C, 8) * Hp * in_itemsize
    per_b = (2 * Lp * Cp * in_itemsize          # x block (double-buffered)
             + 2 * Lp * Hp * out_itemsize       # output block (double-buffered)
             + 2 * Lp * Cp * in_itemsize        # two shifted halo copies
             + Lp * C3p * in_itemsize           # fused im2col operand
             + Lp * Hp * 4)                     # f32 accumulator before the store cast
    return w_bytes + bb * per_b


def _choose_block_b(B, Lp, C, H, *, budget_bytes, out_itemsize, multi_tc):
    base = _vmem_estimate(0, Lp, C, H, out_itemsize)
    per_b = _vmem_estimate(1, Lp, C, H, out_itemsize) - base
    bb = max(1, min(B, int((budget_bytes - base) // max(per_b, 1))))
    if multi_tc and B >= 2:
        # keep >= 4 grid steps (>= 2 for tiny B) so both TensorCores get work
        # and each core overlaps one block's writeback with the next's compute
        bb = min(bb, max(1, B // min(B, 4)))
    while B % bb:  # no partial batch blocks
        bb -= 1
    return int(bb)


# ----------------------------------------------------------------------------
# Wrapper
# ----------------------------------------------------------------------------
def _pallas_embed(x_in, w, *, bb, L, Lp, out_dtype, vmem_limit, single_buffer_weight):
    B, _, C = x_in.shape
    H = w.shape[1]
    w_spec_kwargs = {}
    if single_buffer_weight:
        # resident weight: block index never changes -> one buffer is enough
        w_spec_kwargs = dict(pipeline_mode=pl.Buffered(1))

    return pl.pallas_call(
        _make_kernel(L, Lp),
        out_shape=jax.ShapeDtypeStruct((B, L, H), out_dtype),
        grid_spec=pltpu.PrefetchScalarGridSpec(
            num_scalar_prefetch=0,
            grid=(B // bb,),
            in_specs=[
                pl.BlockSpec((bb, Lp, C), lambda b: (b, 0, 0)),          # x (batch-blocked)
                pl.BlockSpec((3 * C, H), lambda b: (0, 0), **w_spec_kwargs),  # packed weight
            ],
            out_specs=pl.BlockSpec((bb, L, H), lambda b: (b, 0, 0)),
        ),
        compiler_params=pltpu.CompilerParams(
            dimension_semantics=("parallel",),
            vmem_limit_bytes=vmem_limit,
        ),
    )(x_in, w)


def data_embedding(x, weight_pt, *, block_b=None, compute_dtype=jnp.bfloat16,
                   out_dtype=None):
    """Circular Conv1d token embedding.

    x: (B, L, C) float; weight_pt: (H, C, 3) PyTorch Conv1d weight layout.
    Returns (B, L, H) in `out_dtype` (defaults to the bf16 compute dtype;
    pass out_dtype=jnp.float32 for full-width output).
    """
    B, L, C = x.shape
    H = weight_pt.shape[0]
    assert weight_pt.shape == (H, C, 3)
    if out_dtype is None:
        out_dtype = compute_dtype          # bf16 writeback: op is HBM-writeback bound
    out_itemsize = jnp.dtype(out_dtype).itemsize

    # Pack the weight once: row k*C + c of w is weight[h, c, k] (tap-major).
    w = jnp.transpose(weight_pt, (2, 1, 0)).reshape(3 * C, H).astype(compute_dtype)
    x_in = x.astype(compute_dtype)

    # Keep the kernel-visible sequence length a multiple of 8 so the in-kernel
    # (bb, Lp, 3C) -> (bb*Lp, 3C) reshape is a layout-preserving merge.
    # Padding is circular-consistent: xp[L] = x[0] and xp[Lp-1] = x[L-1] keep
    # the wrap (over Lp) correct for the first L rows; rows >= L are never stored.
    Lp = _round_up(L, 8)
    if Lp != L and Lp - L < 2:
        Lp += 8                            # need >= 2 pad rows to carry both halo rows
    if Lp != L:
        pad = Lp - L
        x_in = jnp.concatenate(
            [x_in,
             x_in[:, :1, :],
             jnp.zeros((B, pad - 2, C), x_in.dtype),
             x_in[:, L - 1:, :]],
            axis=1)

    # Generation-aware block / VMEM sizing.
    vmem_cap = _tpu_vmem_capacity_bytes()
    multi_tc = _has_multiple_tensorcores()
    budget = min(int(0.35 * vmem_cap), 32 * 1024 * 1024)
    if block_b is None:
        bb = _choose_block_b(B, Lp, C, H, budget_bytes=budget,
                             out_itemsize=out_itemsize, multi_tc=multi_tc)
    else:
        bb = int(block_b)
    assert B % bb == 0, "block_b must divide the batch size"

    vmem_est = _vmem_estimate(bb, Lp, C, H, out_itemsize, weight_buffers=2)
    vmem_limit = int(min(max(vmem_cap - 20 * 1024 * 1024, 32 * 1024 * 1024),
                         max(32 * 1024 * 1024, 2 * vmem_est)))

    try:
        return _pallas_embed(x_in, w, bb=bb, L=L, Lp=Lp, out_dtype=out_dtype,
                             vmem_limit=vmem_limit, single_buffer_weight=True)
    except Exception:
        # pl.Buffered(1) not accepted by this JAX version -> default buffering.
        return _pallas_embed(x_in, w, bb=bb, L=L, Lp=Lp, out_dtype=out_dtype,
                             vmem_limit=vmem_limit, single_buffer_weight=False)


# ----------------------------------------------------------------------------
# Pure-JAX reference (mirrors the PyTorch circular Conv1d)
# ----------------------------------------------------------------------------
def _reference(x, weight_pt):
    B, L, C = x.shape
    H = weight_pt.shape[0]
    xp = jnp.concatenate([x[:, -1:, :], x, x[:, :1, :]], axis=1)   # (B, L+2, C)
    out = jnp.zeros((B, L, H), jnp.float32)
    for k in range(3):
        wk = weight_pt[:, :, k].T                                  # (C, H)
        out = out + jnp.einsum("blc,ch->blh", xp[:, k:k + L, :], wk,
                               preferred_element_type=jnp.float32)
    return out


if __name__ == "__main__":
    B, L, C, H = 4, 16, 4, 32

    key = jax.random.PRNGKey(0)
    kx, kw = jax.random.split(key)
    x = jax.random.normal(kx, (B, L, C), dtype=jnp.float32)

    # kaiming_normal_(mode='fan_in', nonlinearity='leaky_relu') for (H, C, 3) weight
    fan_in = C * 3
    negative_slope = 0.01
    gain = math.sqrt(2.0 / (1.0 + negative_slope ** 2))
    std = gain / math.sqrt(fan_in)
    weight_pt = std * jax.random.normal(kw, (H, C, 3), dtype=jnp.float32)

    ref_bf16 = _reference(x.astype(jnp.bfloat16).astype(jnp.float32),
                          weight_pt.astype(jnp.bfloat16).astype(jnp.float32))
    ref_f32 = _reference(x, weight_pt)

    # Default (bf16 writeback) path.
    out = jax.block_until_ready(data_embedding(x, weight_pt))
    assert out.shape == (B, L, H)
    assert out.dtype == jnp.bfloat16
    out_f32 = out.astype(jnp.float32)
    assert jnp.allclose(out_f32, ref_bf16, atol=2e-2, rtol=2e-2), "mismatch vs bf16 reference"
    assert jnp.allclose(out_f32, ref_f32, atol=7e-2, rtol=7e-2), "mismatch vs f32 reference"

    # Full-width output path (closer to PyTorch f32 numerics; bf16 MXU operands).
    out32 = jax.block_until_ready(data_embedding(x, weight_pt, out_dtype=jnp.float32))
    assert out32.dtype == jnp.float32
    assert jnp.allclose(out32, ref_bf16, atol=5e-3, rtol=5e-3), "mismatch (f32 out) vs bf16 reference"

    # L % 8 != 0 path (exercises the circular-consistent sequence padding).
    L2 = 10
    x2 = jax.random.normal(jax.random.PRNGKey(1), (B, L2, C), dtype=jnp.float32)
    out2 = jax.block_until_ready(data_embedding(x2, weight_pt))
    assert out2.shape == (B, L2, H)
    ref2 = _reference(x2.astype(jnp.bfloat16).astype(jnp.float32),
                      weight_pt.astype(jnp.bfloat16).astype(jnp.float32))
    assert jnp.allclose(out2.astype(jnp.float32), ref2, atol=2e-2, rtol=2e-2), \
        "mismatch on non-multiple-of-8 sequence length"

    print("KERNEL_OK")
</pallas_src>

<mosaic_0001>
module attributes {stable_mosaic.version = 11 : i64} {
  func.func @data_embedding_kernel(%arg0: i32, %arg1: memref<4x16x4xbf16, #tpu.memory_space<vmem>>, %arg2: memref<12x32xbf16, #tpu.memory_space<vmem>>, %arg3: memref<4x16x32xbf16, #tpu.memory_space<vmem>>) attributes {dimension_semantics = [#tpu.dimension_semantics<parallel>], iteration_bounds = array<i64: 1>, scalar_prefetch = 0 : i64, scratch_operands = 0 : i64, tpu.core_type = #tpu.core_type<tc>, window_params = [{transform_indices = @transform_0, window_bounds = array<i64: 4, 16, 4>}, {pipeline_mode = #tpu.pipeline_mode<synchronous>, transform_indices = @transform_1, window_bounds = array<i64: 12, 32>}, {transform_indices = @transform_2, window_bounds = array<i64: 4, 16, 32>}]} {
    %c0 = arith.constant 0 : index
    %c0_0 = arith.constant 0 : index
    %c0_1 = arith.constant 0 : index
    %0 = vector.load %arg1[%c0, %c0_0, %c0_1] : memref<4x16x4xbf16, #tpu.memory_space<vmem>>, vector<4x16x4xbf16>
    %1 = vector.extract_strided_slice %0 {offsets = [0, 15, 0], sizes = [4, 1, 4], strides = [1, 1, 1]} : vector<4x16x4xbf16> to vector<4x1x4xbf16>
    %2 = vector.extract_strided_slice %0 {offsets = [0, 0, 0], sizes = [4, 15, 4], strides = [1, 1, 1]} : vector<4x16x4xbf16> to vector<4x15x4xbf16>
    %3 = tpu.concatenate %1, %2 in 1 : vector<4x1x4xbf16>, vector<4x15x4xbf16> -> vector<4x16x4xbf16>
    %4 = vector.extract_strided_slice %0 {offsets = [0, 1, 0], sizes = [4, 15, 4], strides = [1, 1, 1]} : vector<4x16x4xbf16> to vector<4x15x4xbf16>
    %5 = vector.extract_strided_slice %0 {offsets = [0, 0, 0], sizes = [4, 1, 4], strides = [1, 1, 1]} : vector<4x16x4xbf16> to vector<4x1x4xbf16>
    %6 = tpu.concatenate %4, %5 in 1 : vector<4x15x4xbf16>, vector<4x1x4xbf16> -> vector<4x16x4xbf16>
    %7 = tpu.concatenate %3, %0, %6 in 2 : vector<4x16x4xbf16>, vector<4x16x4xbf16>, vector<4x16x4xbf16> -> vector<4x16x12xbf16>
    %8 = vector.shape_cast %7 : vector<4x16x12xbf16> to vector<64x12xbf16>
    %c0_2 = arith.constant 0 : index
    %c0_3 = arith.constant 0 : index
    %9 = vector.load %arg2[%c0_2, %c0_3] : memref<12x32xbf16, #tpu.memory_space<vmem>>, vector<12x32xbf16>
    %cst = arith.constant dense<0.000000e+00> : vector<64x32xf32>
    %10 = tpu.matmul %8, %9, %cst {dimension_numbers = #tpu.dot_dimension_numbers<[1], [0], [0], [1], [0, 0, 1, 1], [], []>} : vector<64x12xbf16>, vector<12x32xbf16>, vector<64x32xf32> -> vector<64x32xf32>
    %11 = vector.shape_cast %10 : vector<64x32xf32> to vector<4x16x32xf32>
    %12 = arith.truncf %11 : vector<4x16x32xf32> to vector<4x16x32xbf16>
    %c0_4 = arith.constant 0 : index
    %c0_5 = arith.constant 0 : index
    %c0_6 = arith.constant 0 : index
    %13 = vector.load %arg3[%c0_4, %c0_5, %c0_6] : memref<4x16x32xbf16, #tpu.memory_space<vmem>>, vector<4x16x32xbf16>
    tpu.vector_store %arg3[%c0_4, %c0_5, %c0_6], %12 {strides = array<i32>} : memref<4x16x32xbf16, #tpu.memory_space<vmem>>, vector<4x16x32xbf16>,
    return
  }
  func.func @transform_0(%arg0: i32) -> (i32, i32, i32) {
    %c0_i32 = arith.constant 0 : i32
    %c0_i32_0 = arith.constant 0 : i32
    %c0_i32_1 = arith.constant 0 : i32
    return %arg0, %c0_i32, %c0_i32_0 : i32, i32, i32
  }
  func.func @transform_1(%arg0: i32) -> (i32, i32) {
    %c0_i32 = arith.constant 0 : i32
    %c0_i32_0 = arith.constant 0 : i32
    %c0_i32_1 = arith.constant 0 : i32
    return %c0_i32, %c0_i32_0 : i32, i32
  }
  func.func @transform_2(%arg0: i32) -> (i32, i32, i32) {
    %c0_i32 = arith.constant 0 : i32
    %c0_i32_0 = arith.constant 0 : i32
    %c0_i32_1 = arith.constant 0 : i32
    return %arg0, %c0_i32, %c0_i32_0 : i32, i32, i32
  }
}

module attributes {stable_mosaic.version = 11 : i64} {
  func.func @data_embedding_kernel(%arg0: i32, %arg1: memref<4x16x4xbf16, #tpu.memory_space<vmem>>, %arg2: memref<12x32xbf16, #tpu.memory_space<vmem>>, %arg3: memref<4x16x32xbf16, #tpu.memory_space<vmem>>) attributes {dimension_semantics = [#tpu.dimension_semantics<parallel>], iteration_bounds = array<i64: 1>, scalar_prefetch = 0 : i64, scratch_operands = 0 : i64, tpu.core_type = #tpu.core_type<tc>, window_params = [{transform_indices = @transform_0, window_bounds = array<i64: 4, 16, 4>}, {pipeline_mode = #tpu.pipeline_mode<synchronous>, transform_indices = @transform_1, window_bounds = array<i64: 12, 32>}, {transform_indices = @transform_2, window_bounds = array<i64: 4, 16, 32>}]} {
    %c0 = arith.constant 0 : index
    %c0_0 = arith.constant 0 : index
    %c0_1 = arith.constant 0 : index
    %0 = vector.load %arg1[%c0, %c0_0, %c0_1] : memref<4x16x4xbf16, #tpu.memory_space<vmem>>, vector<4x16x4xbf16>
    %1 = vector.extract_strided_slice %0 {offsets = [0, 15, 0], sizes = [4, 1, 4], strides = [1, 1, 1]} : vector<4x16x4xbf16> to vector<4x1x4xbf16>
    %2 = vector.extract_strided_slice %0 {offsets = [0, 0, 0], sizes = [4, 15, 4], strides = [1, 1, 1]} : vector<4x16x4xbf16> to vector<4x15x4xbf16>
    %3 = tpu.concatenate %1, %2 in 1 : vector<4x1x4xbf16>, vector<4x15x4xbf16> -> vector<4x16x4xbf16>
    %4 = vector.extract_strided_slice %0 {offsets = [0, 1, 0], sizes = [4, 15, 4], strides = [1, 1, 1]} : vector<4x16x4xbf16> to vector<4x15x4xbf16>
    %5 = vector.extract_strided_slice %0 {offsets = [0, 0, 0], sizes = [4, 1, 4], strides = [1, 1, 1]} : vector<4x16x4xbf16> to vector<4x1x4xbf16>
    %6 = tpu.concatenate %4, %5 in 1 : vector<4x15x4xbf16>, vector<4x1x4xbf16> -> vector<4x16x4xbf16>
    %7 = tpu.concatenate %3, %0, %6 in 2 : vector<4x16x4xbf16>, vector<4x16x4xbf16>, vector<4x16x4xbf16> -> vector<4x16x12xbf16>
    %8 = vector.shape_cast %7 : vector<4x16x12xbf16> to vector<64x12xbf16>
    %c0_2 = arith.constant 0 : index
    %c0_3 = arith.constant 0 : index
    %9 = vector.load %arg2[%c0_2, %c0_3] : memref<12x32xbf16, #tpu.memory_space<vmem>>, vector<12x32xbf16>
    %cst = arith.constant dense<0.000000e+00> : vector<64x32xf32>
    %10 = tpu.matmul %8, %9, %cst {dimension_numbers = #tpu.dot_dimension_numbers<[1], [0], [0], [1], [0, 0, 1, 1], [], []>} : vector<64x12xbf16>, vector<12x32xbf16>, vector<64x32xf32> -> vector<64x32xf32>
    %11 = vector.shape_cast %10 : vector<64x32xf32> to vector<4x16x32xf32>
    %12 = arith.truncf %11 : vector<4x16x32xf32> to vector<4x16x32xbf16>
    %c0_4 = arith.constant 0 : index
    %c0_5 = arith.constant 0 : index
    %c0_6 = arith.constant 0 : index
    %13 = vector.load %arg3[%c0_4, %c0_5, %c0_6] : memref<4x16x32xbf16, #tpu.memory_space<vmem>>, vector<4x16x32xbf16>
    tpu.vector_store %arg3[%c0_4, %c0_5, %c0_6], %12 {strides = array<i32>} : memref<4x16x32xbf16, #tpu.memory_space<vmem>>, vector<4x16x32xbf16>,
    return
  }
  func.func @transform_0(%arg0: i32) -> (i32, i32, i32) {
    %c0_i32 = arith.constant 0 : i32
    %c0_i32_0 = arith.constant 0 : i32
    %c0_i32_1 = arith.constant 0 : i32
    return %arg0, %c0_i32, %c0_i32_0 : i32, i32, i32
  }
  func.func @transform_1(%arg0: i32) -> (i32, i32) {
    %c0_i32 = arith.constant 0 : i32
    %c0_i32_0 = arith.constant 0 : i32
    %c0_i32_1 = arith.constant 0 : i32
    return %c0_i32, %c0_i32_0 : i32, i32
  }
  func.func @transform_2(%arg0: i32) -> (i32, i32, i32) {
    %c0_i32 = arith.constant 0 : i32
    %c0_i32_0 = arith.constant 0 : i32
    %c0_i32_1 = arith.constant 0 : i32
    return %arg0, %c0_i32, %c0_i32_0 : i32, i32, i32
  }
}

</mosaic_0001>

<bundles_post_ra>
// kernel: tpu_custom_call.1
= control target key start
LH: loop header
LB: loop body
LE: loop exit
PB: predicated region body
PF: predicated region fallthrough
CT: control target
= control target key end

     0   :  { %vm140_vm0 = vcmask 1047552   ;;  %s424_s25 = smov 4   ;;  %s532_s0 = inlined_call_operand.vmem [shape: bf16[4,16,4], index: 0, kind: input, shape index: {}]   ;;  %s533_s1 = inlined_call_operand.vmem [shape: bf16[12,32], index: 1, kind: input, shape index: {}]   ;;  %s534_s2 = inlined_call_operand.hbm [shape: bf16[4,16,32], index: 2, kind: output, shape index: {}]  }
   0x1   :  { %v15_v0 = vld [vmem:[%s532_s0 + $0x8] sm:$0xf]  ;;  %v16_v1 = vld [vmem:[%s532_s0 + $0xc] sm:$0xf]  ;;  %v13_v5 = vld [vmem:[%s532_s0] sm:$0xf] }
   0x2   :  { %v332_v2 = vcombine.low %v16_v1, %v16_v1  ;;  %v449_v3 = vcombine.low %v15_v0, %v16_v1  ;;  %v340_v4 = vcombine.low %v15_v0, %v15_v0  ;;  %v14_v6 = vld [vmem:[%s532_s0 + $0x4] sm:$0xf]  ;;  %v19_v7 = vld [vmem:[%s532_s0 + $0x18] sm:$0xf]  ;;  %v339_v10 = vcombine.low %v13_v5, %v13_v5  ;;  %v20_v11 = vld [vmem:[%s532_s0 + $0x1c] sm:$0xf] }
   0x3   :  { %v331_v8 = vcombine.low %v14_v6, %v14_v6  ;;  %v460_v9 = vcombine.low %v13_v5, %v14_v6  ;;  %v342_v12 = vcombine.low %v19_v7, %v19_v7  ;;  %v17_v13 = vld [vmem:[%s532_s0 + $0x10] sm:$0xf]  ;;  %v18_v14 = vld [vmem:[%s532_s0 + $0x14] sm:$0xf]  ;;  %v334_v18 = vcombine.low %v20_v11, %v20_v11 }
   0x4   :  { %v471_v15 = vshrl.u32 %v332_v2, 16  ;;  %v473_v16 = vshll.u32 %v340_v4, 16  ;;  %149 = vrot.lane.b32.xlu1 %v449_v3, %s424_s25  ;;  %v76_v17 = vshll.u32 %v449_v3, 16  ;;  %v121_v20 = vshll.u32 %v339_v10, 16 }
   0x5   :  { %v34_v19 = vshrl.u32 %v331_v8, 16  ;;  %147 = vrot.lane.b32.xlu0 %v460_v9, %s424_s25  ;;  %v69_v21 = vshll.u32 %v460_v9, 16  ;;  %v338_v22 = vcombine.low %v19_v7, %v20_v11  ;;  %v46_v24 = vshrl.u32 %v334_v18, 16 }
   0x6   :  { %v40_v23 = vrot.slane %v471_v15, 3  ;;  %v133_v25 = vshll.u32 %v342_v12, 16  ;;  %v333_v26 = vcombine.low %v18_v14, %v18_v14  ;;  %v337_v29 = vcombine.low %v17_v13, %v18_v14 }
   0x7   :  { %v36_v27 = vrot.slane %v34_v19, 3  ;;  %v90_v28 = vshll.u32 %v338_v22, 16  ;;  %v341_v30 = vcombine.low %v17_v13, %v17_v13 }
   0x8   :  { %7 = vsyncpa [#allocation3], 0  ;;  %v48_v31 = vrot.slane %v46_v24, 3  ;;  %153 = vrot.lane.b32.xlu1 %v338_v22, %s424_s25  ;;  %v42_v32 = vshrl.u32 %v333_v26, 16  ;;  %vm141_vm1 = vsmask.f32 7424 }
   0x9   :  { %v66_v33 = vshrl.u32 %v460_v9, 16  ;;  %v83_v34 = vshll.u32 %v337_v29, 16  ;;  %v129_v35 = vshll.u32 %v341_v30, 16  ;;  %151 = vrot.lane.b32.xlu0 %v337_v29, %s424_s25  ;;  %v80_v36 = vshrl.u32 %v337_v29, 16  ;;  %vm486_vm2 = vmand %vm140_vm0, %vm141_vm1  ;;  %s425_s0 = smov 8  }
   0xa   :  { %v104_v37 = vrot.slane %v69_v21, 1  ;;  %v44_v38 = vrot.slane %v42_v32, 3  ;;  %v123_v40 = vrot.slane %v121_v20, 1  ;;  %v87_v42 = vshrl.u32 %v338_v22, 16  ;;  %v399_v57 = vld [vmem:[%s533_s1] sm:$0x3f]  }
   0xb   :  { %v68_v41 = vrot.slane %v66_v33, 7  ;;  %v82_v43 = vrot.slane %v80_v36, 7  ;;  %v108_v44 = vrot.slane %v83_v34, 1  ;;  %v131_v45 = vrot.slane %v129_v35, 1  ;;  %s426_s1 = smov [#allocation2]  }
   0xc   :  { %v105_v46 = vor.u32 %v104_v37, %v66_v33  ;;  %v89_v47 = vrot.slane %v87_v42, 7  ;;  %v110_v48 = vrot.slane %v90_v28, 1  ;;  %v135_v49 = vrot.slane %v133_v25, 1  ;;  %s320_s28 = sshll.u32 %s426_s1, 4  ;;  %s321_s28 = int_to_ptr.vmem [resolvable:$true] %s320_s28 }
   0xd   :  { %v73_v50 = vshrl.u32 %v449_v3, 16  ;;  %v109_v51 = vor.u32 %v108_v44, %v80_v36  ;;  %v106_v53 = vrot.slane %v76_v17, 1  ;;  %v127_v54 = vrot.slane %v473_v16, 1  ;;  %s400_s29 = scalar_lea.vmem %s321_s28, 512  ;;  %p405_p1 = scmp.lt.s32.totalorder %s321_s28, %s321_s28 }
   0xe   :  { %v143_v52 = vsel %vm486_vm2, %v105_v46, %v123_v40  ;;  %v111_v55 = vor.u32 %v110_v48, %v87_v42  ;;  %vm97_vm3 = vcmask 1040384   ;;  %vm98_vm4 = vsmask.f32 256  ;;  %p401_p0 = scmp.ne.s32.totalorder %s321_s28, %s400_s29  ;;  %p406_p2 = scmp.lt.s32.totalorder %s400_s29, %s400_s29 }
   0xf   :  { %159 = vrot.lane.b32.xlu0 %v143_v52, %s425_s0  ;;  %v75_v56 = vrot.slane %v73_v50, 7  ;;  %v145_v58 = vsel %vm486_vm2, %v109_v51, %v131_v45  ;;  %v107_v59 = vor.u32 %v106_v53, %v73_v50  ;;  %vm99_vm5 = vmand %vm97_vm3, %vm98_vm4  ;;  %v71_v60 = vor.u32 %v69_v21, %v68_v41 }
  0x10   :  { %163 = vrot.lane.b32.xlu1 %v145_v58, %s425_s0  ;;  %v92_v62 = vor.u32 %v90_v28, %v89_v47  ;;  %v85_v63 = vor.u32 %v83_v34, %v82_v43  ;;  %v146_v0 = vsel %vm486_vm2, %v111_v55, %v135_v49  ;;  %vm205_vm6 = vcmask 1045504   ;;  %p407_p3 = por %p406_p2, %p405_p1 }
  0x11   :  { %v78_v61 = vor.u32 %v76_v17, %v75_v56  ;;  %v144_v1 = vsel %vm486_vm2, %v107_v59, %v127_v54  ;;  %v100_v2 = vsel %vm99_vm5, %v36_v27, %v71_v60  ;;  %381 = vmatprep.subr.msk.bf16.mxu0 %vm205_vm6, %v399_v57  ;;  %382 = vmatprep.subr.msk.bf16.mxu1 %vm205_vm6, %v399_v57  ;;  %v207_v6 = vsel %vm205_vm6, %v399_v57, 0 }
  0x12   :  { %v103_v4 = vsel %vm99_vm5, %v48_v31, %v92_v62  ;;  %v102_v5 = vsel %vm99_vm5, %v44_v38, %v85_v63  ;;  %370 = vmatpush3.bf16.msra.mxu0 %v207_v6  ;;  %380 = vmatpush3.bf16.msra.mxu1 %v207_v6  ;;  %vm167_vm7 = vcmask 31744   ;;  %vm180_vm8 = vcmask 64512   ;;  %p408_p4 = pnand %p407_p3, %p401_p0 }
  0x13   :  { %161 = vrot.lane.b32.xlu0 %v144_v1, %s425_s0  ;;  %v101_v3 = vsel %vm99_vm5, %v40_v23, %v78_v61  ;;  %vm196_vm9 = vcmask 97280   ;;  %vm306_vm10 = vcmask 257024  }
  0x14   :  { %165 = vrot.lane.b32.xlu1 %v146_v0, %s425_s0 }
  0x76   :  { %v150_v7 = vpop.permute.xlu1 %149 }
  0x77   :  { %v148_v8 = vpop.permute.xlu0 %147  ;;  %v173_v17 = vsel %vm167_vm7, %v101_v3, %v150_v7 }
  0x78   :  { %v170_v11 = vsel %vm167_vm7, %v100_v2, %v148_v8 }
  0x7a   :  { %v154_v10 = vpop.permute.xlu1 %153 }
  0x7b   :  { %v152_v9 = vpop.permute.xlu0 %151  ;;  %v179_v20 = vsel %vm167_vm7, %v103_v4, %v154_v10 }
  0x7c   :  { %v176_v14 = vsel %vm167_vm7, %v102_v5, %v152_v9 }
  0x81   :  { %v160_v12 = vpop.permute.xlu0 %159 }
  0x82   :  { %v182_v13 = vsel %vm180_vm8, %v170_v11, %v160_v12  ;;  %v164_v15 = vpop.permute.xlu1 %163 }
  0x83   :  { %371 = vmatprep.mubr.msk.bf16.mxu0 %vm196_vm9, %v182_v13  ;;  %v186_v16 = vsel %vm180_vm8, %v176_v14, %v164_v15 }
  0x84   :  { %375 = vmatprep.mubr.msk.bf16.mxu1 %vm196_vm9, %v186_v16 }
  0x85   :  { %v162_v18 = vpop.permute.xlu0 %161 }
  0x86   :  { %v184_v19 = vsel %vm180_vm8, %v173_v17, %v162_v18  ;;  %v166_v21 = vpop.permute.xlu1 %165 }
  0x87   :  { %372 = vmatmul.mubr.msk.bf16.vlgmr.msra.gmra.mrb[0].mxu0 %vm196_vm9, %v184_v19  ;;  %v188_v22 = vsel %vm180_vm8, %v179_v20, %v166_v21 }
  0x88   :  { %376 = vmatmul.mubr.msk.bf16.vlgmr.msra.gmra.mrb[0].mxu1 %vm196_vm9, %v188_v22 }
 0x15a   :  { %v373_v23 = vpop.f32.mrb[0].mxu0 }
 0x15b   :  { %v358_v24 = vpack.c.bf16 %v373_v23, %v373_v23  ;;  %v243_v25 = vpop.f32.mrb[1].mxu0  ;;  %v377_v26 = vpop.f32.mrb[0].mxu1 }
 0x15c   :  { %v356_v27 = vpack.c.bf16 %v243_v25, %v243_v25  ;;  %v374_v28 = vpop.f32.mrb[2].mxu0  ;;  %v362_v29 = vpack.c.bf16 %v377_v26, %v377_v26  ;;  %v259_v30 = vpop.f32.mrb[1].mxu1 }
 0x15d   :  { %309 = vst.msk [vmem:[#allocation2 + $0x8] sm:$0xf] %vm306_vm10, %v358_v24  ;;  %v359_v31 = vpack.c.bf16 %v374_v28, %v374_v28  ;;  %v246_v32 = vpop.f32.mrb[3].mxu0  ;;  %v360_v33 = vpack.c.bf16 %v259_v30, %v259_v30  ;;  %v378_v34 = vpop.f32.mrb[2].mxu1 }
 0x15e   :  { %307 = vst.msk [vmem:[#allocation2] sm:$0xf] %vm306_vm10, %v356_v27  ;;  %v357_v35 = vpack.c.bf16 %v246_v32, %v246_v32  ;;  %313 = vst.msk [vmem:[#allocation2 + $0x18] sm:$0xf] %vm306_vm10, %v362_v29  ;;  %v363_v36 = vpack.c.bf16 %v378_v34, %v378_v34  ;;  %v262_v37 = vpop.f32.mrb[3].mxu1 }
 0x15f   :  { %310 = vst.msk [vmem:[#allocation2 + $0xc] sm:$0xf] %vm306_vm10, %v359_v31  ;;  %311 = vst.msk [vmem:[#allocation2 + $0x10] sm:$0xf] %vm306_vm10, %v360_v33  ;;  %v361_v38 = vpack.c.bf16 %v262_v37, %v262_v37 }
 0x160   :  { %308 = vst.msk [vmem:[#allocation2 + $0x4] sm:$0xf] %vm306_vm10, %v357_v35  ;;  %314 = vst.msk [vmem:[#allocation2 + $0x1c] sm:$0xf] %vm306_vm10, %v363_v36 }
 0x161   :  { %312 = vst.msk [vmem:[#allocation2 + $0x14] sm:$0xf] %vm306_vm10, %v361_v38 }
 0x162   :  { %411 = shalt.err (!%p408_p4)
}
 0x163   :  { %s412_s4 = scalar_lea.hbm %s534_s2, 512 }
 0x164   :  { %p413_p5 = scmp.ne.s32.totalorder %s534_s2, %s412_s4  ;;  %p416_p6 = scmp.lt.u32.totalorder %s412_s4, %s534_s2 }
 0x166   :  { %p418_p7 = pnand %p416_p6, %p413_p5 }
 0x168   :  { %421 = shalt.err (!%p418_p7)
}
 0x169   :  { %s427_s9 = smov 64  }
 0x16a   :  { %326 = dma.vmem_to_hbm [thread:$0]  %s321_s28, 512, %s534_s2, [#allocation3], %s427_s9, %s427_s9, %s424_s25  }
 0x16b   :  { %422 = dma.done.wait [#allocation3], 512  }
 0x16c   :  { %423 = vsyncadd [#allocation3], 4294966784 }
 0x16d   :  { %330 = vsyncpa [#allocation3], 1 }

// kernel: tpu_custom_call.1
= control target key start
LH: loop header
LB: loop body
LE: loop exit
PB: predicated region body
PF: predicated region fallthrough
CT: control target
= control target key end

     0   :  { %vm140_vm0 = vcmask 1047552   ;;  %s424_s25 = smov 4   ;;  %s532_s0 = inlined_call_operand.vmem [shape: bf16[4,16,4], index: 0, kind: input, shape index: {}]   ;;  %s533_s1 = inlined_call_operand.vmem [shape: bf16[12,32], index: 1, kind: input, shape index: {}]   ;;  %s534_s2 = inlined_call_operand.hbm [shape: bf16[4,16,32], index: 2, kind: output, shape index: {}]  }
   0x1   :  { %v15_v0 = vld [vmem:[%s532_s0 + $0x8] sm:$0xf]  ;;  %v16_v1 = vld [vmem:[%s532_s0 + $0xc] sm:$0xf]  ;;  %v13_v5 = vld [vmem:[%s532_s0] sm:$0xf] }
   0x2   :  { %v332_v2 = vcombine.low %v16_v1, %v16_v1  ;;  %v449_v3 = vcombine.low %v15_v0, %v16_v1  ;;  %v340_v4 = vcombine.low %v15_v0, %v15_v0  ;;  %v14_v6 = vld [vmem:[%s532_s0 + $0x4] sm:$0xf]  ;;  %v19_v7 = vld [vmem:[%s532_s0 + $0x18] sm:$0xf]  ;;  %v339_v10 = vcombine.low %v13_v5, %v13_v5  ;;  %v20_v11 = vld [vmem:[%s532_s0 + $0x1c] sm:$0xf] }
   0x3   :  { %v331_v8 = vcombine.low %v14_v6, %v14_v6  ;;  %v460_v9 = vcombine.low %v13_v5, %v14_v6  ;;  %v342_v12 = vcombine.low %v19_v7, %v19_v7  ;;  %v17_v13 = vld [vmem:[%s532_s0 + $0x10] sm:$0xf]  ;;  %v18_v14 = vld [vmem:[%s532_s0 + $0x14] sm:$0xf]  ;;  %v334_v18 = vcombine.low %v20_v11, %v20_v11 }
   0x4   :  { %v471_v15 = vshrl.u32 %v332_v2, 16  ;;  %v473_v16 = vshll.u32 %v340_v4, 16  ;;  %149 = vrot.lane.b32.xlu1 %v449_v3, %s424_s25  ;;  %v76_v17 = vshll.u32 %v449_v3, 16  ;;  %v121_v20 = vshll.u32 %v339_v10, 16 }
   0x5   :  { %v34_v19 = vshrl.u32 %v331_v8, 16  ;;  %147 = vrot.lane.b32.xlu0 %v460_v9, %s424_s25  ;;  %v69_v21 = vshll.u32 %v460_v9, 16  ;;  %v338_v22 = vcombine.low %v19_v7, %v20_v11  ;;  %v46_v24 = vshrl.u32 %v334_v18, 16 }
   0x6   :  { %v40_v23 = vrot.slane %v471_v15, 3  ;;  %v133_v25 = vshll.u32 %v342_v12, 16  ;;  %v333_v26 = vcombine.low %v18_v14, %v18_v14  ;;  %v337_v29 = vcombine.low %v17_v13, %v18_v14 }
   0x7   :  { %v36_v27 = vrot.slane %v34_v19, 3  ;;  %v90_v28 = vshll.u32 %v338_v22, 16  ;;  %v341_v30 = vcombine.low %v17_v13, %v17_v13 }
   0x8   :  { %7 = vsyncpa [#allocation3], 0  ;;  %v48_v31 = vrot.slane %v46_v24, 3  ;;  %153 = vrot.lane.b32.xlu1 %v338_v22, %s424_s25  ;;  %v42_v32 = vshrl.u32 %v333_v26, 16  ;;  %vm141_vm1 = vsmask.f32 7424 }
   0x9   :  { %v66_v33 = vshrl.u32 %v460_v9, 16  ;;  %v83_v34 = vshll.u32 %v337_v29, 16  ;;  %v129_v35 = vshll.u32 %v341_v30, 16  ;;  %151 = vrot.lane.b32.xlu0 %v337_v29, %s424_s25  ;;  %v80_v36 = vshrl.u32 %v337_v29, 16  ;;  %vm486_vm2 = vmand %vm140_vm0, %vm141_vm1  ;;  %s425_s0 = smov 8  }
   0xa   :  { %v104_v37 = vrot.slane %v69_v21, 1  ;;  %v44_v38 = vrot.slane %v42_v32, 3  ;;  %v123_v40 = vrot.slane %v121_v20, 1  ;;  %v87_v42 = vshrl.u32 %v338_v22, 16  ;;  %v399_v57 = vld [vmem:[%s533_s1] sm:$0x3f]  }
   0xb   :  { %v68_v41 = vrot.slane %v66_v33, 7  ;;  %v82_v43 = vrot.slane %v80_v36, 7  ;;  %v108_v44 = vrot.slane %v83_v34, 1  ;;  %v131_v45 = vrot.slane %v129_v35, 1  ;;  %s426_s1 = smov [#allocation2]  }
   0xc   :  { %v105_v46 = vor.u32 %v104_v37, %v66_v33  ;;  %v89_v47 = vrot.slane %v87_v42, 7  ;;  %v110_v48 = vrot.slane %v90_v28, 1  ;;  %v135_v49 = vrot.slane %v133_v25, 1  ;;  %s320_s28 = sshll.u32 %s426_s1, 4  ;;  %s321_s28 = int_to_ptr.vmem [resolvable:$true] %s320_s28 }
   0xd   :  { %v73_v50 = vshrl.u32 %v449_v3, 16  ;;  %v109_v51 = vor.u32 %v108_v44, %v80_v36  ;;  %v106_v53 = vrot.slane %v76_v17, 1  ;;  %v127_v54 = vrot.slane %v473_v16, 1  ;;  %s400_s29 = scalar_lea.vmem %s321_s28, 512  ;;  %p405_p1 = scmp.lt.s32.totalorder %s321_s28, %s321_s28 }
   0xe   :  { %v143_v52 = vsel %vm486_vm2, %v105_v46, %v123_v40  ;;  %v111_v55 = vor.u32 %v110_v48, %v87_v42  ;;  %vm97_vm3 = vcmask 1040384   ;;  %vm98_vm4 = vsmask.f32 256  ;;  %p401_p0 = scmp.ne.s32.totalorder %s321_s28, %s400_s29  ;;  %p406_p2 = scmp.lt.s32.totalorder %s400_s29, %s400_s29 }
   0xf   :  { %159 = vrot.lane.b32.xlu0 %v143_v52, %s425_s0  ;;  %v75_v56 = vrot.slane %v73_v50, 7  ;;  %v145_v58 = vsel %vm486_vm2, %v109_v51, %v131_v45  ;;  %v107_v59 = vor.u32 %v106_v53, %v73_v50  ;;  %vm99_vm5 = vmand %vm97_vm3, %vm98_vm4  ;;  %v71_v60 = vor.u32 %v69_v21, %v68_v41 }
  0x10   :  { %163 = vrot.lane.b32.xlu1 %v145_v58, %s425_s0  ;;  %v92_v62 = vor.u32 %v90_v28, %v89_v47  ;;  %v85_v63 = vor.u32 %v83_v34, %v82_v43  ;;  %v146_v0 = vsel %vm486_vm2, %v111_v55, %v135_v49  ;;  %vm205_vm6 = vcmask 1045504   ;;  %p407_p3 = por %p406_p2, %p405_p1 }
  0x11   :  { %v78_v61 = vor.u32 %v76_v17, %v75_v56  ;;  %v144_v1 = vsel %vm486_vm2, %v107_v59, %v127_v54  ;;  %v100_v2 = vsel %vm99_vm5, %v36_v27, %v71_v60  ;;  %381 = vmatprep.subr.msk.bf16.mxu0 %vm205_vm6, %v399_v57  ;;  %382 = vmatprep.subr.msk.bf16.mxu1 %vm205_vm6, %v399_v57  ;;  %v207_v6 = vsel %vm205_vm6, %v399_v57, 0 }
  0x12   :  { %v103_v4 = vsel %vm99_vm5, %v48_v31, %v92_v62  ;;  %v102_v5 = vsel %vm99_vm5, %v44_v38, %v85_v63  ;;  %370 = vmatpush3.bf16.msra.mxu0 %v207_v6  ;;  %380 = vmatpush3.bf16.msra.mxu1 %v207_v6  ;;  %vm167_vm7 = vcmask 31744   ;;  %vm180_vm8 = vcmask 64512   ;;  %p408_p4 = pnand %p407_p3, %p401_p0 }
  0x13   :  { %161 = vrot.lane.b32.xlu0 %v144_v1, %s425_s0  ;;  %v101_v3 = vsel %vm99_vm5, %v40_v23, %v78_v61  ;;  %vm196_vm9 = vcmask 97280   ;;  %vm306_vm10 = vcmask 257024  }
  0x14   :  { %165 = vrot.lane.b32.xlu1 %v146_v0, %s425_s0 }
  0x76   :  { %v150_v7 = vpop.permute.xlu1 %149 }
  0x77   :  { %v148_v8 = vpop.permute.xlu0 %147  ;;  %v173_v17 = vsel %vm167_vm7, %v101_v3, %v150_v7 }
  0x78   :  { %v170_v11 = vsel %vm167_vm7, %v100_v2, %v148_v8 }
  0x7a   :  { %v154_v10 = vpop.permute.xlu1 %153 }
  0x7b   :  { %v152_v9 = vpop.permute.xlu0 %151  ;;  %v179_v20 = vsel %vm167_vm7, %v103_v4, %v154_v10 }
  0x7c   :  { %v176_v14 = vsel %vm167_vm7, %v102_v5, %v152_v9 }
  0x81   :  { %v160_v12 = vpop.permute.xlu0 %159 }
  0x82   :  { %v182_v13 = vsel %vm180_vm8, %v170_v11, %v160_v12  ;;  %v164_v15 = vpop.permute.xlu1 %163 }
  0x83   :  { %371 = vmatprep.mubr.msk.bf16.mxu0 %vm196_vm9, %v182_v13  ;;  %v186_v16 = vsel %vm180_vm8, %v176_v14, %v164_v15 }
  0x84   :  { %375 = vmatprep.mubr.msk.bf16.mxu1 %vm196_vm9, %v186_v16 }
  0x85   :  { %v162_v18 = vpop.permute.xlu0 %161 }
  0x86   :  { %v184_v19 = vsel %vm180_vm8, %v173_v17, %v162_v18  ;;  %v166_v21 = vpop.permute.xlu1 %165 }
  0x87   :  { %372 = vmatmul.mubr.msk.bf16.vlgmr.msra.gmra.mrb[0].mxu0 %vm196_vm9, %v184_v19  ;;  %v188_v22 = vsel %vm180_vm8, %v179_v20, %v166_v21 }
  0x88   :  { %376 = vmatmul.mubr.msk.bf16.vlgmr.msra.gmra.mrb[0].mxu1 %vm196_vm9, %v188_v22 }
 0x15a   :  { %v373_v23 = vpop.f32.mrb[0].mxu0 }
 0x15b   :  { %v358_v24 = vpack.c.bf16 %v373_v23, %v373_v23  ;;  %v243_v25 = vpop.f32.mrb[1].mxu0  ;;  %v377_v26 = vpop.f32.mrb[0].mxu1 }
 0x15c   :  { %v356_v27 = vpack.c.bf16 %v243_v25, %v243_v25  ;;  %v374_v28 = vpop.f32.mrb[2].mxu0  ;;  %v362_v29 = vpack.c.bf16 %v377_v26, %v377_v26  ;;  %v259_v30 = vpop.f32.mrb[1].mxu1 }
 0x15d   :  { %309 = vst.msk [vmem:[#allocation2 + $0x8] sm:$0xf] %vm306_vm10, %v358_v24  ;;  %v359_v31 = vpack.c.bf16 %v374_v28, %v374_v28  ;;  %v246_v32 = vpop.f32.mrb[3].mxu0  ;;  %v360_v33 = vpack.c.bf16 %v259_v30, %v259_v30  ;;  %v378_v34 = vpop.f32.mrb[2].mxu1 }
 0x15e   :  { %307 = vst.msk [vmem:[#allocation2] sm:$0xf] %vm306_vm10, %v356_v27  ;;  %v357_v35 = vpack.c.bf16 %v246_v32, %v246_v32  ;;  %313 = vst.msk [vmem:[#allocation2 + $0x18] sm:$0xf] %vm306_vm10, %v362_v29  ;;  %v363_v36 = vpack.c.bf16 %v378_v34, %v378_v34  ;;  %v262_v37 = vpop.f32.mrb[3].mxu1 }
 0x15f   :  { %310 = vst.msk [vmem:[#allocation2 + $0xc] sm:$0xf] %vm306_vm10, %v359_v31  ;;  %311 = vst.msk [vmem:[#allocation2 + $0x10] sm:$0xf] %vm306_vm10, %v360_v33  ;;  %v361_v38 = vpack.c.bf16 %v262_v37, %v262_v37 }
 0x160   :  { %308 = vst.msk [vmem:[#allocation2 + $0x4] sm:$0xf] %vm306_vm10, %v357_v35  ;;  %314 = vst.msk [vmem:[#allocation2 + $0x1c] sm:$0xf] %vm306_vm10, %v363_v36 }
 0x161   :  { %312 = vst.msk [vmem:[#allocation2 + $0x14] sm:$0xf] %vm306_vm10, %v361_v38 }
 0x162   :  { %411 = shalt.err (!%p408_p4)
}
 0x163   :  { %s412_s4 = scalar_lea.hbm %s534_s2, 512 }
 0x164   :  { %p413_p5 = scmp.ne.s32.totalorder %s534_s2, %s412_s4  ;;  %p416_p6 = scmp.lt.u32.totalorder %s412_s4, %s534_s2 }
 0x166   :  { %p418_p7 = pnand %p416_p6, %p413_p5 }
 0x168   :  { %421 = shalt.err (!%p418_p7)
}
 0x169   :  { %s427_s9 = smov 64  }
 0x16a   :  { %326 = dma.vmem_to_hbm [thread:$0]  %s321_s28, 512, %s534_s2, [#allocation3], %s427_s9, %s427_s9, %s424_s25  }
 0x16b   :  { %422 = dma.done.wait [#allocation3], 512  }
 0x16c   :  { %423 = vsyncadd [#allocation3], 4294966784 }
 0x16d   :  { %330 = vsyncpa [#allocation3], 1 }

</bundles_post_ra>
